<compile_context>
chip_gen: v7x
topology: tpu7x:2x2x1
jax: 0.10.0
libtpu: 0.0.40
codegen_flags: <defaults>
</compile_context>

<pallas_src>
import jax
import jax.numpy as jnp
from jax import lax
from jax.experimental import pallas as pl
from jax.experimental.pallas import tpu as pltpu

BN_EPS = 1e-5
LEAKY_SLOPE = 0.01          # nn.LeakyReLU default negative_slope
LANE = 128
SUBLANE = 8
VMEM_TILE_BUDGET = 28 << 20  # conservative per-step footprint; fits v7x 64 MiB w/ headroom


def _round_up(v, m):
    return (v + m - 1) // m * m


# --------------------------- kernel A: matmul + batch stats ---------------------------
def _linear_stats_kernel(x_ref, w_hbm_ref, y_ref, stats_ref, w_vmem_ref):
    tile = pl.program_id(0)

    @pl.when(tile == 0)
    def _():
        # Stage the (out_p, in_f) weight into VMEM exactly once (single copy; a plain
        # BlockSpec would double-buffer it even though its index never changes).
        pltpu.sync_copy(w_hbm_ref, w_vmem_ref)
        stats_ref[...] = jnp.zeros_like(stats_ref)

    # Contract x (block_n, in_f) with the PyTorch-layout weight (out_p, in_f) directly
    # (NT matmul, same pattern as attention's q @ k^T).  The Linear bias is NOT added:
    # it cancels exactly under train-mode BatchNorm, and leaving it out keeps
    # zero-padded batch rows exactly zero so they never pollute the statistics.
    y = lax.dot_general(
        x_ref[...], w_vmem_ref[...],
        dimension_numbers=(((1,), (1,)), ((), ())),
        preferred_element_type=jnp.float32,
    )                                                    # (block_n, out_p) f32
    y_ref[...] = y                                       # f32 intermediate (the y cache)
    stats_ref[0:1, :] += jnp.sum(y, axis=0, keepdims=True)
    stats_ref[1:2, :] += jnp.sum(y * y, axis=0, keepdims=True)


# ------------------- kernel B: BatchNorm affine + LeakyReLU (+Dropout p=0) ------------
def _bn_leakyrelu_kernel(y_ref, ss_ref, o_ref):
    scale = ss_ref[0:1, :]                               # (1, out_p)
    shift = ss_ref[1:2, :]
    y_hat = y_ref[...] * scale + shift                   # fused BN: 2 VPU ops / element
    # LeakyReLU as mul + max; Dropout(p=0.0) is the identity.
    o_ref[...] = jnp.maximum(y_hat, LEAKY_SLOPE * y_hat).astype(o_ref.dtype)


# ----------------------------------- wrapper ------------------------------------------
def _cap_block_rows(requested, n, in_f, out_p, out_itemsize):
    bn = min(_round_up(max(requested, SUBLANE), SUBLANE), _round_up(n, SUBLANE))

    def tile_bytes(b):
        k1 = 2 * b * in_f * 4 + 2 * b * out_p * 4 + out_p * in_f * 4 + 2 * 8 * out_p * 4
        k2 = 2 * b * out_p * 4 + 2 * b * out_p * out_itemsize + 2 * 8 * out_p * 4
        return max(k1, k2)

    while bn > SUBLANE and tile_bytes(bn) > VMEM_TILE_BUDGET:
        bn = _round_up(bn // 2, SUBLANE)
    return bn, tile_bytes(bn)


def basic_linear_forward(x, weight, bias, gamma, beta, *, block_rows=512):
    """x: (N, in_features); weight: (out, in) PyTorch layout; bias/gamma/beta: (out,).

    `bias` is accepted for interface fidelity but provably cancels under train-mode
    BatchNorm ((y + b) - mean(y + b) == y - mean(y)), so it never enters the kernels.
    """
    del bias
    n, in_f = x.shape
    out_f, in_f_w = weight.shape
    assert in_f_w == in_f

    f32 = jnp.float32
    out_p = _round_up(out_f, LANE)                       # lane-dense output columns
    out_itemsize = jnp.dtype(x.dtype).itemsize
    block_n, est_bytes = _cap_block_rows(block_rows, n, in_f, out_p, out_itemsize)
    n_tiles = pl.cdiv(n, block_n)
    n_pad = n_tiles * block_n

    xp = x.astype(f32)
    if n_pad != n:
        xp = jnp.pad(xp, ((0, n_pad - n), (0, 0)))       # zero rows -> zero stats contribution
    wp = weight.astype(f32)
    if out_p != out_f:
        wp = jnp.pad(wp, ((0, out_p - out_f), (0, 0)))   # pad output channels

    # Explicit scoped-VMEM limit (default is 16 MiB on v5e / 32 MiB on v6e+v7x); always
    # >= our estimated need, capped well under v7x's 64 MiB physical VMEM.
    vmem_limit = max(min(int(est_bytes * 1.5) + (2 << 20), 48 << 20), 32 << 20)

    # ---- pass A: y = x @ W^T and per-column [sum; sum-of-squares] over the FULL batch
    y, stats = pl.pallas_call(
        _linear_stats_kernel,
        out_shape=(jax.ShapeDtypeStruct((n_pad, out_p), f32),
                   jax.ShapeDtypeStruct((2, out_p), f32)),
        grid_spec=pltpu.PrefetchScalarGridSpec(
            num_scalar_prefetch=0,
            grid=(n_tiles,),
            in_specs=[
                pl.BlockSpec((block_n, in_f), lambda i: (i, 0)),   # x row tile
                pl.BlockSpec(memory_space=pl.ANY),                 # weight stays in HBM
            ],
            out_specs=(
                pl.BlockSpec((block_n, out_p), lambda i: (i, 0)),  # y cache (f32)
                pl.BlockSpec((2, out_p), lambda i: (0, 0)),        # resident stats accumulator
            ),
            scratch_shapes=[pltpu.VMEM((out_p, in_f), f32)],       # single-buffered weight
        ),
        compiler_params=pltpu.CompilerParams(
            dimension_semantics=("arbitrary",),   # stats couple all row tiles -> sequential
            vmem_limit_bytes=vmem_limit,
        ),
    )(xp, wp)

    # ---- tile-invariant BN math, computed once on (out_p,) vectors (biased/train var)
    inv_n = jnp.float32(1.0 / n)
    mean = stats[0] * inv_n
    var = jnp.maximum(stats[1] * inv_n - mean * mean, 0.0)
    # TODO(synk): E[y^2]-mean^2 can lose precision if |mean| >> std; a centered second
    #             pass over the cached y would be exact at the cost of one extra HBM read.
    inv_std = lax.rsqrt(var + BN_EPS)
    gamma_p = gamma.astype(f32)
    beta_p = beta.astype(f32)
    if out_p != out_f:
        gamma_p = jnp.pad(gamma_p, (0, out_p - out_f))
        beta_p = jnp.pad(beta_p, (0, out_p - out_f))
    scale = gamma_p * inv_std
    shift = beta_p - mean * scale
    ss = jnp.stack([scale, shift]).astype(f32)           # (2, out_p): one tiny DMA

    # ---- pass B: normalize + LeakyReLU, pure VPU/mem-bound, row tiles fully independent
    out = pl.pallas_call(
        _bn_leakyrelu_kernel,
        out_shape=jax.ShapeDtypeStruct((n_pad, out_p), x.dtype),
        grid_spec=pltpu.PrefetchScalarGridSpec(
            num_scalar_prefetch=0,
            grid=(n_tiles,),
            in_specs=[
                pl.BlockSpec((block_n, out_p), lambda i: (i, 0)),  # y tile (f32)
                pl.BlockSpec((2, out_p), lambda i: (0, 0)),        # scale/shift slab
            ],
            out_specs=pl.BlockSpec((block_n, out_p), lambda i: (i, 0)),
        ),
        compiler_params=pltpu.CompilerParams(
            dimension_semantics=("parallel",),    # independent tiles -> v7x 2-TC split
            vmem_limit_bytes=vmem_limit,
        ),
    )(y, ss)

    return out[:n, :out_f]


# --------------------------------- pure-JAX reference ---------------------------------
def reference_forward(x, weight, bias, gamma, beta):
    y = x @ weight.T + bias
    mean = y.mean(axis=0, keepdims=True)
    var = ((y - mean) ** 2).mean(axis=0, keepdims=True)   # biased var (training mode)
    y_hat = (y - mean) / jnp.sqrt(var + BN_EPS) * gamma + beta
    return jnp.where(y_hat >= 0, y_hat, LEAKY_SLOPE * y_hat)


if __name__ == "__main__":
    # Small shapes consistent with the module; block_rows=8 forces 2 row tiles so the
    # two-pass BN (stats accumulation across tiles, then normalize) is exercised.
    N, IN_F, OUT_F = 16, 32, 64

    key = jax.random.PRNGKey(0)
    kx, kw, kb, kg, kbt = jax.random.split(key, 5)

    x = jax.random.normal(kx, (N, IN_F), dtype=jnp.float32)

    bound = 1.0 / (IN_F ** 0.5)
    weight = jax.random.uniform(kw, (OUT_F, IN_F), minval=-bound, maxval=bound,
                                dtype=jnp.float32)
    bias = jax.random.uniform(kb, (OUT_F,), minval=-bound, maxval=bound,
                              dtype=jnp.float32)
    # perturb BN affine params away from (1, 0) init so gamma/beta paths are exercised
    gamma = 1.0 + 0.1 * jax.random.normal(kg, (OUT_F,), dtype=jnp.float32)
    beta = 0.1 * jax.random.normal(kbt, (OUT_F,), dtype=jnp.float32)

    out = basic_linear_forward(x, weight, bias, gamma, beta, block_rows=8)
    out = jax.block_until_ready(out)

    ref = reference_forward(x, weight, bias, gamma, beta)
    assert out.shape == (N, OUT_F)
    assert jnp.allclose(out, ref, atol=1e-5, rtol=1e-5), "mismatch vs reference"

    print("KERNEL_OK")
</pallas_src>

<mosaic_0001>
module attributes {stable_mosaic.version = 11 : i64} {
  func.func @_linear_stats_kernel(%arg0: i32, %arg1: memref<8x32xf32, #tpu.memory_space<vmem>>, %arg2: memref<128x32xf32, #tpu.memory_space<any>>, %arg3: memref<8x128xf32, #tpu.memory_space<vmem>>, %arg4: memref<2x128xf32, #tpu.memory_space<vmem>>, %arg5: memref<128x32xf32, #tpu.memory_space<vmem>>) attributes {dimension_semantics = [#tpu.dimension_semantics<arbitrary>], iteration_bounds = array<i64: 2>, scalar_prefetch = 0 : i64, scratch_operands = 1 : i64, tpu.core_type = #tpu.core_type<tc>, window_params = [{transform_indices = @transform_0, window_bounds = array<i64: 8, 32>}, {}, {transform_indices = @transform_2, window_bounds = array<i64: 8, 128>}, {pipeline_mode = #tpu.pipeline_mode<synchronous>, transform_indices = @transform_3, window_bounds = array<i64: 2, 128>}]} {
    %c0_i32 = arith.constant 0 : i32
    %0 = arith.cmpi eq, %arg0, %c0_i32 : i32
    %1 = arith.extui %0 : i1 to i32
    %c0_i32_0 = arith.constant 0 : i32
    %2 = arith.cmpi ne, %1, %c0_i32_0 : i32
    scf.if %2 {
      "tpu.region"() ({
        %20 = tpu.sem_alloc : memref<!tpu.dma_semaphore, #tpu.memory_space<semaphore_mem>>
        tpu.enqueue_dma source(%arg2 : memref<128x32xf32, #tpu.memory_space<any>>) target(%arg5 : memref<128x32xf32, #tpu.memory_space<vmem>>) target_semaphore(%20 : memref<!tpu.dma_semaphore, #tpu.memory_space<semaphore_mem>>)
        tpu.wait_dma2 semaphore(%20 : memref<!tpu.dma_semaphore, #tpu.memory_space<semaphore_mem>>) src(%arg2 : memref<128x32xf32, #tpu.memory_space<any>>) dst(%arg5 : memref<128x32xf32, #tpu.memory_space<vmem>>)
        tpu.yield
      }) : () -> ()
      %cst_15 = arith.constant 0.000000e+00 : f32
      %18 = vector.broadcast %cst_15 : f32 to vector<2x128xf32>
      %c0_16 = arith.constant 0 : index
      %c0_17 = arith.constant 0 : index
      %19 = vector.load %arg4[%c0_16, %c0_17] : memref<2x128xf32, #tpu.memory_space<vmem>>, vector<2x128xf32>
      tpu.vector_store %arg4[%c0_16, %c0_17], %18 {strides = array<i32>} : memref<2x128xf32, #tpu.memory_space<vmem>>, vector<2x128xf32>,
    } else {
    }
    %c0 = arith.constant 0 : index
    %c0_1 = arith.constant 0 : index
    %3 = vector.load %arg1[%c0, %c0_1] : memref<8x32xf32, #tpu.memory_space<vmem>>, vector<8x32xf32>
    %c0_2 = arith.constant 0 : index
    %c0_3 = arith.constant 0 : index
    %4 = vector.load %arg5[%c0_2, %c0_3] : memref<128x32xf32, #tpu.memory_space<vmem>>, vector<128x32xf32>
    %cst = arith.constant dense<0.000000e+00> : vector<8x128xf32>
    %5 = tpu.matmul %3, %4, %cst {dimension_numbers = #tpu.dot_dimension_numbers<[1], [1], [0], [0], [0, 0, 1, 0], [], []>} : vector<8x32xf32>, vector<128x32xf32>, vector<8x128xf32> -> vector<8x128xf32>
    %c0_4 = arith.constant 0 : index
    %c0_5 = arith.constant 0 : index
    %6 = vector.load %arg3[%c0_4, %c0_5] : memref<8x128xf32, #tpu.memory_space<vmem>>, vector<8x128xf32>
    tpu.vector_store %arg3[%c0_4, %c0_5], %5 {strides = array<i32>} : memref<8x128xf32, #tpu.memory_space<vmem>>, vector<8x128xf32>,
    %c0_6 = arith.constant 0 : index
    %c0_7 = arith.constant 0 : index
    %7 = vector.load %arg4[%c0_6, %c0_7] : memref<2x128xf32, #tpu.memory_space<vmem>>, vector<1x128xf32>
    %cst_8 = arith.constant dense<0.000000e+00> : vector<128xf32>
    %8 = vector.multi_reduction <add>, %5, %cst_8 [0] : vector<8x128xf32> to vector<128xf32>
    %9 = vector.shape_cast %8 : vector<128xf32> to vector<1x128xf32>
    %10 = arith.addf %7, %9 : vector<1x128xf32>
    %c0_9 = arith.constant 0 : index
    %c0_10 = arith.constant 0 : index
    %11 = vector.load %arg4[%c0_9, %c0_10] : memref<2x128xf32, #tpu.memory_space<vmem>>, vector<1x128xf32>
    tpu.vector_store %arg4[%c0_9, %c0_10], %10 {strides = array<i32>} : memref<2x128xf32, #tpu.memory_space<vmem>>, vector<1x128xf32>,
    %c1 = arith.constant 1 : index
    %c0_11 = arith.constant 0 : index
    %12 = vector.load %arg4[%c1, %c0_11] : memref<2x128xf32, #tpu.memory_space<vmem>>, vector<1x128xf32>
    %13 = arith.mulf %5, %5 : vector<8x128xf32>
    %cst_12 = arith.constant dense<0.000000e+00> : vector<128xf32>
    %14 = vector.multi_reduction <add>, %13, %cst_12 [0] : vector<8x128xf32> to vector<128xf32>
    %15 = vector.shape_cast %14 : vector<128xf32> to vector<1x128xf32>
    %16 = arith.addf %12, %15 : vector<1x128xf32>
    %c1_13 = arith.constant 1 : index
    %c0_14 = arith.constant 0 : index
    %17 = vector.load %arg4[%c1_13, %c0_14] : memref<2x128xf32, #tpu.memory_space<vmem>>, vector<1x128xf32>
    tpu.vector_store %arg4[%c1_13, %c0_14], %16 {strides = array<i32>} : memref<2x128xf32, #tpu.memory_space<vmem>>, vector<1x128xf32>,
    return
  }
  func.func @transform_0(%arg0: i32) -> (i32, i32) {
    %c0_i32 = arith.constant 0 : i32
    %c0_i32_0 = arith.constant 0 : i32
    return %arg0, %c0_i32 : i32, i32
  }
  func.func @transform_2(%arg0: i32) -> (i32, i32) {
    %c0_i32 = arith.constant 0 : i32
    %c0_i32_0 = arith.constant 0 : i32
    return %arg0, %c0_i32 : i32, i32
  }
  func.func @transform_3(%arg0: i32) -> (i32, i32) {
    %c0_i32 = arith.constant 0 : i32
    %c0_i32_0 = arith.constant 0 : i32
    %c0_i32_1 = arith.constant 0 : i32
    return %c0_i32, %c0_i32_0 : i32, i32
  }
}

</mosaic_0001>

<bundles_post_ra>
// kernel: tpu_custom_call.1
= control target key start
LH: loop header
LB: loop body
LE: loop exit
PB: predicated region body
PF: predicated region fallthrough
CT: control target
= control target key end

     0   :  { %9 = vsyncpa [#allocation4], 0  ;;  %s977_s0 = inlined_call_operand.vmem [shape: f32[16,32], index: 0, kind: input, shape index: {}]   ;;  %s978_s1 = inlined_call_operand.vmem [shape: f32[128,32], index: 1, kind: input, shape index: {}]   ;;  %s979_s2 = inlined_call_operand.hbm [shape: f32[16,128], index: 2, kind: output, shape index: {0}]   ;;  %s980_s3 = inlined_call_operand.hbm [shape: f32[2,128], index: 3, kind: output, shape index: {1}]  }
   0x1   :  { %11 = vsyncpa [#allocation4 + $0x1], 0 }
   0x2   :  { %12 = vsyncpa [#allocation6], 0  ;;  %s767_s12 = smov 0   ;;  %s769_s13 = smov 0  }
   0x3   :  { %s771_s14 = smov 0   ;;  %s773_s15 = smov 0  }
   0x4 LB: > { %s788_s16 = sadd.s32 4294967295, %s739_s15   ;;  %s481_s17 = sadd.s32 4294967294, %s739_s15   ;;  %s739_s15 = sphi %s773_s15, %s988_s15   ;;  %s735_s14 = sphi %s771_s14, %s987_s14   ;;  %s731_s13 = sphi %s769_s13, %s986_s13   ;;  %s727_s12 = sphi %s767_s12, %s985_s12  }
   0x5   : > { %s792_s18 = sadd.s32 1, %s739_s15   ;;  %s51_s19 = sadd.s32 1, %s735_s14 }
   0x6   : > { %s48_s20 = ssub.s32 %s739_s15, %s792_s18  ;;  %p61_p0 = scmp.ne.s32.totalorder %s735_s14, %s731_s13 }
   0x7   : > { %p49_p1 = scmp.eq.s32.totalorder %s48_s20, 0  ;;  %p62_p2 = scmp.eq.s32.totalorder %s788_s16, 1 }
   0x8   : > { %p67_p3 = scmp.ne.s32.totalorder %s731_s13, %s727_s12  ;;  %p68_p4 = scmp.eq.s32.totalorder %s481_s17, 1 }
   0x9   : > { %s803_s21 = scalar_select %p49_p1, %s735_s14, %s51_s19  }
   0xa   : > { %p807_p5 = por %p62_p2, %p61_p0  ;;  %p811_p6 = por %p68_p4, %p67_p3 }
   0xb   : > { %p484_p7 = scmp.ge.s32.totalorder %s739_s15, 1  ;;  %p114_p8 = scmp.lt.s32.totalorder %s739_s15, 3 }
   0xd   : > { %p115_p9 = pnand %p484_p7, %p114_p8 }
   0xe   : > { %s130_s24 = sand.u32 (!%p115_p9), 1, %s731_s13   ;;  %p135_p10 = scmp.lt.s32.totalorder (!%p115_p9), %s788_s16, 1 }
   0xf   : > { %118 = sbr.rel (%p115_p9) target bundleno = 363 (0x16b), region = 24  ;;  %s821_s25 = sshll.u32 (!%p115_p9), %s130_s24, 3 }
  0x10   : > { %s132_s4 = scalar_lea.vmem (!%p115_p9), [#allocation3], %s821_s25  ;;  %p487_p11 = scmp.ne.s32.totalorder (!%p115_p9), %s788_s16, 0 }
  0x16   : > { %s136_s26 = scalar_select %p135_p10, %s788_s16, 1 }
  0x17   : > { %142 = sbr.rel (%p487_p11) target bundleno = 43 (0x2b), region = 28 }
  0x18   : > { %s486_s27 = sshll.u32 %s136_s26, 3 }
  0x19   : > { %s827_s30 = scalar_lea.vmem %s977_s0, %s486_s27 }
  0x1e   : > { %v175_v0 = vld [vmem:[%s978_s1] sm:$0xff]  ;;  %v177_v1 = vld [vmem:[%s978_s1 + $0x8] sm:$0xff]  ;;  %v179_v2 = vld [vmem:[%s978_s1 + $0x10] sm:$0xff] }
  0x1f   : > { %176 = vst [vmem:[#allocation2] sm:$0xff] %v175_v0  ;;  %178 = vst [vmem:[#allocation2 + $0x8] sm:$0xff] %v177_v1  ;;  %v181_v3 = vld [vmem:[%s978_s1 + $0x18] sm:$0xff]  ;;  %v183_v4 = vld [vmem:[%s978_s1 + $0x20] sm:$0xff] }
  0x20   : > { %180 = vst [vmem:[#allocation2 + $0x10] sm:$0xff] %v179_v2  ;;  %v185_v5 = vld [vmem:[%s978_s1 + $0x28] sm:$0xff]  ;;  %182 = vst [vmem:[#allocation2 + $0x18] sm:$0xff] %v181_v3  ;;  %v187_v6 = vld [vmem:[%s978_s1 + $0x30] sm:$0xff] }
  0x21   : > { %184 = vst [vmem:[#allocation2 + $0x20] sm:$0xff] %v183_v4  ;;  %186 = vst [vmem:[#allocation2 + $0x28] sm:$0xff] %v185_v5  ;;  %v189_v7 = vld [vmem:[%s978_s1 + $0x38] sm:$0xff]  ;;  %v191_v8 = vld [vmem:[%s978_s1 + $0x40] sm:$0xff] }
  0x22   : > { %188 = vst [vmem:[#allocation2 + $0x30] sm:$0xff] %v187_v6  ;;  %190 = vst [vmem:[#allocation2 + $0x38] sm:$0xff] %v189_v7  ;;  %v193_v9 = vld [vmem:[%s978_s1 + $0x48] sm:$0xff]  ;;  %v195_v10 = vld [vmem:[%s978_s1 + $0x50] sm:$0xff] }
  0x23   : > { %192 = vst [vmem:[#allocation2 + $0x40] sm:$0xff] %v191_v8  ;;  %v197_v11 = vld [vmem:[%s978_s1 + $0x58] sm:$0xff]  ;;  %194 = vst [vmem:[#allocation2 + $0x48] sm:$0xff] %v193_v9  ;;  %v199_v12 = vld [vmem:[%s978_s1 + $0x60] sm:$0xff] }
  0x24   : > { %196 = vst [vmem:[#allocation2 + $0x50] sm:$0xff] %v195_v10  ;;  %198 = vst [vmem:[#allocation2 + $0x58] sm:$0xff] %v197_v11  ;;  %v201_v13 = vld [vmem:[%s978_s1 + $0x68] sm:$0xff]  ;;  %v203_v14 = vld [vmem:[%s978_s1 + $0x70] sm:$0xff] }
  0x25   : > { %200 = vst [vmem:[#allocation2 + $0x60] sm:$0xff] %v199_v12  ;;  %202 = vst [vmem:[#allocation2 + $0x68] sm:$0xff] %v201_v13  ;;  %v205_v15 = vld [vmem:[%s978_s1 + $0x78] sm:$0xff] }
  0x26   : > { %204 = vst [vmem:[#allocation2 + $0x70] sm:$0xff] %v203_v14  ;;  %206 = vst [vmem:[#allocation2 + $0x78] sm:$0xff] %v205_v15 }
  0x27   : > { %214 = vsyncadd [#allocation7], 2048 }
  0x28   : > { %715 = dma.done.wait [#allocation7], 2048 }
  0x29   : > { %716 = vsyncadd [#allocation7], 4294965248  ;;  %v741_v16 = vmov 0.0  }
  0x2a   : > { %218 = vst [vmem:[#allocation5] sm:$0x3] %v741_v16 }
  0x2b PF: > { %v220_v17 = vld [vmem:[#allocation2] sm:$0xff]  ;;  %v221_v18 = vld [vmem:[#allocation2 + $0x8] sm:$0xff]  ;;  %vm236_vm0 = vcmask 261120   ;;  %v742_v19 = vmov 0.0|0.0   ;;  %vm743_vm2 = vmmov 0   ;;  %v744_v22 = vmov 0.0  }
  0x2c   : > { %563 = vmatprep.subr.bf16.mxu0 %v742_v19  ;;  %v564_v20 = vpack.c.bf16 %v221_v18, %v220_v17  ;;  %vm881_vm1 = vmpackc.low %vm236_vm0, %vm236_vm0  ;;  %560 = vmatprep.mubr.msk.f32.mxu0 %vm743_vm2, %v744_v22  ;;  %v222_v23 = vld [vmem:[#allocation2 + $0x10] sm:$0xff]  ;;  %v223_v24 = vld [vmem:[#allocation2 + $0x18] sm:$0xff]  ;;  %s506_s9 = sshll.u32 %s788_s16, 7  ;;  %s392_s10 = sshll.u32 %s132_s4, 4  ;;  %s911_s10 = int_to_ptr.vmem [resolvable:$true] %s392_s10 }
  0x2d   : > { %v568_v25 = vpack.c.bf16 %v223_v24, %v222_v23  ;;  %v224_v26 = vld [vmem:[#allocation2 + $0x20] sm:$0xff]  ;;  %v225_v27 = vld [vmem:[#allocation2 + $0x28] sm:$0xff]  ;;  %v226_v29 = vld [vmem:[#allocation2 + $0x30] sm:$0xff]  ;;  %s909_s19 = scalar_lea.hbm %s979_s2, %s506_s9  ;;  %s645_s20 = scalar_lea.vmem %s911_s10, 128 }
  0x2e   : > { %566 = vmatpush3.bf16.xpose.msk.msra.mxu0 %vm881_vm1, %v564_v20  ;;  %v572_v28 = vpack.c.bf16 %v225_v27, %v224_v26  ;;  %v227_v30 = vld [vmem:[#allocation2 + $0x38] sm:$0xff]  ;;  %v228_v32 = vld [vmem:[#allocation2 + $0x40] sm:$0xff]  ;;  %v229_v33 = vld [vmem:[#allocation2 + $0x48] sm:$0xff]  ;;  %p646_p12 = scmp.ne.s32.totalorder %s911_s10, %s645_s20  ;;  %s745_s26 = smov [#allocation3]  }
  0x2f   : > { %567 = vmatprep.subr.bf16.mxu0 %v742_v19  ;;  %v576_v31 = vpack.c.bf16 %v227_v30, %v226_v29  ;;  %v580_v34 = vpack.c.bf16 %v229_v33, %v228_v32  ;;  %v230_v35 = vld [vmem:[#allocation2 + $0x50] sm:$0xff]  ;;  %v231_v36 = vld [vmem:[#allocation2 + $0x58] sm:$0xff]  ;;  %v232_v38 = vld [vmem:[#allocation2 + $0x60] sm:$0xff]  ;;  %s649_s27 = sshll.u32 %s745_s26, 4  ;;  %s650_s27 = int_to_ptr.vmem [resolvable:$false] %s649_s27 }
  0x30   : > { %v584_v37 = vpack.c.bf16 %v231_v36, %v230_v35  ;;  %v233_v39 = vld [vmem:[#allocation2 + $0x68] sm:$0xff]  ;;  %v234_v41 = vld [vmem:[#allocation2 + $0x70] sm:$0xff]  ;;  %v235_v42 = vld [vmem:[#allocation2 + $0x78] sm:$0xff]  ;;  %p647_p13 = pnand %p646_p12, %p807_p5  ;;  %s651_s28 = scalar_lea.vmem %s650_s27, 256 }
  0x31   : > { %v588_v40 = vpack.c.bf16 %v233_v39, %v232_v38  ;;  %v592_v43 = vpack.c.bf16 %v235_v42, %v234_v41  ;;  %v219_v44 = vld [vmem:[%s827_s30] sm:$0xff]  ;;  %s379_s30 = scalar_lea.sflag [#allocation4], %s130_s24  ;;  %p652_p1 = scmp.lt.s32.totalorder %s911_s10, %s650_s27 }
  0x32   : > { %p648_p0 = pneg %p647_p13  ;;  %p653_p3 = scmp.lt.s32.totalorder %s651_s28, %s645_s20 }
  0x34   : > { %p654_p4 = por %p653_p3, %p652_p1 }
  0x36   : > { %570 = vmatpush3.bf16.xpose.msk.msra.mxu0 %vm881_vm1, %v568_v25  ;;  %p655_p7 = pnand %p654_p4, %p648_p0 }
  0x37   : > { %571 = vmatprep.subr.bf16.mxu0 %v742_v19 }
  0x3e   : > { %574 = vmatpush3.bf16.xpose.msk.msra.mxu0 %vm881_vm1, %v572_v28 }
  0x3f   : > { %575 = vmatprep.subr.bf16.mxu0 %v742_v19 }
  0x46   : > { %578 = vmatpush3.bf16.xpose.msk.msra.mxu0 %vm881_vm1, %v576_v31 }
  0x47   : > { %579 = vmatprep.subr.bf16.mxu0 %v742_v19 }
  0x4e   : > { %582 = vmatpush3.bf16.xpose.msk.msra.mxu0 %vm881_vm1, %v580_v34 }
  0x4f   : > { %583 = vmatprep.subr.bf16.mxu0 %v742_v19 }
  0x56   : > { %586 = vmatpush3.bf16.xpose.msk.msra.mxu0 %vm881_vm1, %v584_v37 }
  0x57   : > { %587 = vmatprep.subr.bf16.mxu0 %v742_v19 }
  0x5e   : > { %590 = vmatpush3.bf16.xpose.msk.msra.mxu0 %vm881_vm1, %v588_v40 }
  0x5f   : > { %591 = vmatprep.subr.bf16.mxu0 %v742_v19 }
  0x66   : > { %594 = vmatpush3.bf16.xpose.msk.msra.mxu0 %vm881_vm1, %v592_v43 }
  0x6d   : > { %561 = vmatmul.mubr.msk.f32.vlgmr.msra.gmra.mrb[0].mxu0 %vm236_vm0, %v219_v44 }
 0x140   : > { %v354_v45 = vpop.f32.mrb[0].mxu0 }
 0x141   : > { %v360_v46 = vrot.slane %v354_v45, 4  ;;  %v369_v47 = vmul.f32 %v354_v45, %v354_v45  ;;  %358 = vst [vmem:[%s132_s4] sm:$0xff] %v354_v45  ;;  %v562_v48 = vpop.f32.mrb[1].mxu0 }
 0x142   : > { %658 = shalt.err (!%p655_p7)
}
 0x143   : > { %s659_s24 = scalar_lea.hbm %s909_s19, 128  ;;  %s663_s29 = scalar_lea.hbm %s979_s2, 256 }
 0x144   : > { %p660_p8 = scmp.ne.s32.totalorder %s909_s19, %s659_s24  ;;  %p664_p11 = scmp.lt.u32.totalorder %s909_s19, %s979_s2 }
 0x145   : > { %p665_p12 = scmp.lt.u32.totalorder %s663_s29, %s659_s24  ;;  %p667_p0 = scmp.lt.u32.totalorder %s659_s24, %s909_s19 }
 0x146   : > { %p661_p9 = pnand %p660_p8, %p807_p5 }
 0x147   : > { %p666_p13 = por %p665_p12, %p664_p11 }
 0x148   : > { %p662_p10 = pneg %p661_p9 }
 0x149   : > { %p668_p1 = por %p667_p0, %p666_p13 }
 0x14b   : > { %p669_p3 = pnand %p668_p1, %p662_p10 }
 0x14d   : > { %672 = shalt.err (!%p669_p3)
}
 0x14e   : > { %595 = dma.vmem_to_hbm [thread:$0]  (%p807_p5), %s911_s10, 128, %s909_s19, %s379_s30   ;;  %v361_v49 = vadd.f32 %v360_v46, %v354_v45  ;;  %v370_v50 = vrot.slane %v369_v47, 4  ;;  %v359_v57 = vld [vmem:[#allocation5] sm:$0x1]  ;;  %v368_v60 = vld [vmem:[#allocation5 + $0x1] sm:$0x1] }
 0x14f   : > { %s746_s7 = smov [#allocation5]  }
 0x150   : > { %v362_v51 = vrot.slane %v361_v49, 2  ;;  %v371_v52 = vadd.f32 %v370_v50, %v369_v47  ;;  %s403_s8 = sshll.u32 %s746_s7, 4  ;;  %s404_s8 = int_to_ptr.vmem [resolvable:$true] %s403_s8 }
 0x151   : > { %s673_s22 = scalar_lea.vmem %s404_s8, 32  ;;  %p680_p8 = scmp.lt.s32.totalorder %s404_s8, %s404_s8 }
 0x152   : > { %v363_v53 = vadd.f32 %v362_v51, %v361_v49  ;;  %v372_v54 = vrot.slane %v371_v52, 2  ;;  %p674_p5 = scmp.ne.s32.totalorder %s404_s8, %s673_s22  ;;  %p681_p9 = scmp.lt.s32.totalorder %s673_s22, %s673_s22 }
 0x154   : > { %v364_v55 = vrot.slane %v363_v53, 1  ;;  %v373_v56 = vadd.f32 %v372_v54, %v371_v52  ;;  %p675_p4 = pnand %p674_p5, %p62_p2  ;;  %p682_p10 = por %p681_p9, %p680_p8 }
 0x156   : > { %v365_v58 = vadd.f32 %v364_v55, %v363_v53  ;;  %v374_v59 = vrot.slane %v373_v56, 1  ;;  %p676_p7 = pneg %p675_p4 }
 0x158   : > { %v366_v61 = vadd.f32 %v365_v58, %v359_v57  ;;  %v375_v62 = vadd.f32 %v374_v59, %v373_v56  ;;  %p683_p11 = pnand %p682_p10, %p676_p7 }
 0x15a   : > { %367 = vst [vmem:[#allocation5] sm:$0x1] %v366_v61  ;;  %v376_v63 = vadd.f32 %v375_v62, %v368_v60 }
 0x15c   : > { %377 = vst [vmem:[#allocation5 + $0x1] sm:$0x1] %v376_v63 }
 0x15d   : > { %686 = shalt.err (!%p683_p11)
}
 0x15e   : > { %s687_s11 = scalar_lea.hbm %s980_s3, 32 }
 0x15f   : > { %p688_p12 = scmp.ne.s32.totalorder %s980_s3, %s687_s11  ;;  %p693_p1 = scmp.lt.u32.totalorder %s687_s11, %s980_s3 }
 0x161   : > { %p689_p13 = pnand %p688_p12, %p62_p2 }
 0x163   : > { %p690_p0 = pneg %p689_p13 }
 0x165   : > { %p695_p3 = pnand %p693_p1, %p690_p0 }
 0x167   : > { %698 = shalt.err (!%p695_p3)
}
 0x168   : > { %597 = dma.vmem_to_hbm [thread:$0]  (%p62_p2), %s404_s8, 32, %s980_s3, [#allocation6]  }
 0x169   : > { %718 = dma.done.wait (%p62_p2), [#allocation6], 32  }
 0x16a   : > { %720 = vsyncadd (%p62_p2), [#allocation6], 4294967264 }
 0x16b PF: > { %p607_p5 = scmp.ge.s32.totalorder %s739_s15, 2  ;;  %s419_s28 = sand.u32 1, %s727_s12  }
 0x16c   : > { %s420_s24 = scalar_lea.sflag [#allocation4], %s419_s28 }
 0x16d   : > { %p602_p4 = pnand %p607_p5, %p811_p6 }
 0x16f   : > { %722 = dma.done.wait (!%p602_p4), %s420_s24, 128  }
 0x170   : > { %724 = vsyncadd (!%p602_p4), %s420_s24, 4294967168  ;;  %p15_p7 = scmp.ge.s32.totalorder %s792_s18, 4   ;;  %s985_s12 = smov %s731_s13 }
 0x171   : > { %s986_s13 = smov %s735_s14  ;;  %s987_s14 = smov %s803_s21 }
 0x172   : > { %s988_s15 = smov %s792_s18  ;;  %17 = sbr.rel (!%p15_p7) target bundleno = 4 (0x4), region = 114 }
 0x179   :  { %425 = vsyncpa [#allocation4], 1 }
 0x17a   :  { %427 = vsyncpa [#allocation4 + $0x1], 1 }
 0x17b   :  { %428 = vsyncpa [#allocation6], 1 }

</bundles_post_ra>
